<compile_context>
chip_gen: v7x
topology: tpu7x:2x2x1
jax: 0.10.0
libtpu: 0.0.40
codegen_flags: <defaults>
</compile_context>

<pallas_src>
import jax
import jax.numpy as jnp
from jax.experimental import pallas as pl
from jax.experimental.pallas import tpu as pltpu


def mlp_kernel(x_ref, w_ref, b_ref, o_ref):
    # x_ref: (TB, F) f32   w_ref: (3, F, F) bf16   b_ref: (3, 1, F) f32
    x = x_ref[...].astype(jnp.bfloat16)

    # Layer 1: (TB, F) @ (F, F) -> f32 acc, bias add + ReLU in f32.
    h1 = jnp.dot(x, w_ref[0], preferred_element_type=jnp.float32) + b_ref[0]
    h1 = jnp.maximum(h1, 0.0).astype(jnp.bfloat16)

    # Layer 2
    h2 = jnp.dot(h1, w_ref[1], preferred_element_type=jnp.float32) + b_ref[1]
    h2 = jnp.maximum(h2, 0.0).astype(jnp.bfloat16)

    # Layer 3 (no activation)
    out = jnp.dot(h2, w_ref[2], preferred_element_type=jnp.float32) + b_ref[2]
    o_ref[...] = out.astype(o_ref.dtype)


def _round_up(n, m):
    return ((n + m - 1) // m) * m


def neural_net_forward(x, w1, b1, w2, b2, w3, b3, *, batch_tile=128):
    batch, input_size = x.shape
    hidden_size = w1.shape[1]
    num_classes = w3.shape[1]

    # Single lane-dense padded feature width for all layers (>= 128).
    F = max(_round_up(d, 128) for d in (input_size, hidden_size, num_classes))

    # Batch tile: multiple of 8 (sublanes); pad batch up to a tile multiple.
    TB = min(batch_tile, _round_up(batch, 8))
    Bp = _round_up(batch, TB)

    # --- pack + pad parameters (2 arrays total -> 2 parameter DMAs) ---------
    xp = jnp.zeros((Bp, F), jnp.float32).at[:batch, :input_size].set(x)

    def pad_w(w):
        return jnp.zeros((F, F), jnp.float32).at[: w.shape[0], : w.shape[1]].set(w)

    def pad_b(b):
        b = b.reshape(1, -1)
        return jnp.zeros((1, F), jnp.float32).at[:, : b.shape[1]].set(b)

    w_packed = jnp.stack([pad_w(w1), pad_w(w2), pad_w(w3)]).astype(jnp.bfloat16)
    b_packed = jnp.stack([pad_b(b1), pad_b(b2), pad_b(b3)])  # (3, 1, F) f32

    grid = (Bp // TB,)
    out_padded = pl.pallas_call(
        mlp_kernel,
        out_shape=jax.ShapeDtypeStruct((Bp, F), jnp.float32),
        grid=grid,
        in_specs=[
            pl.BlockSpec((TB, F), lambda i: (i, 0)),        # x tile, pipelined
            pl.BlockSpec((3, F, F), lambda i: (0, 0, 0)),   # weights, VMEM-resident
            pl.BlockSpec((3, 1, F), lambda i: (0, 0, 0)),   # biases, VMEM-resident
        ],
        out_specs=pl.BlockSpec((TB, F), lambda i: (i, 0)),
        compiler_params=pltpu.CompilerParams(
            dimension_semantics=("parallel",),
        ),
    )(xp, w_packed, b_packed)

    # Strip the padding back off (lane-dense slab -> logical output).
    return out_padded[:batch, :num_classes]


def _init_linear(key, in_features, out_features):
    # Deterministic init mimicking nn.Linear's U(-1/sqrt(in), 1/sqrt(in)).
    kw, kb = jax.random.split(key)
    bound = 1.0 / (in_features ** 0.5)
    w = jax.random.uniform(kw, (in_features, out_features), jnp.float32, -bound, bound)
    b = jax.random.uniform(kb, (1, out_features), jnp.float32, -bound, bound)
    return w, b


def reference_forward(x, w1, b1, w2, b2, w3, b3):
    # Reference with the same bf16-weight / f32-accumulate numerics as the kernel.
    bf = jnp.bfloat16
    h = jnp.dot(x.astype(bf), w1.astype(bf), preferred_element_type=jnp.float32) + b1
    h = jnp.maximum(h, 0.0)
    h = jnp.dot(h.astype(bf), w2.astype(bf), preferred_element_type=jnp.float32) + b2
    h = jnp.maximum(h, 0.0)
    return jnp.dot(h.astype(bf), w3.astype(bf), preferred_element_type=jnp.float32) + b3


if __name__ == "__main__":
    batch, input_size, hidden_size, num_classes = 8, 32, 32, 16

    key = jax.random.PRNGKey(0)
    kx, k1, k2, k3 = jax.random.split(key, 4)

    x = jax.random.normal(kx, (batch, input_size), jnp.float32)
    w1, b1 = _init_linear(k1, input_size, hidden_size)
    w2, b2 = _init_linear(k2, hidden_size, hidden_size)
    w3, b3 = _init_linear(k3, hidden_size, num_classes)

    out = neural_net_forward(x, w1, b1, w2, b2, w3, b3)
    out = jax.block_until_ready(out)

    ref = reference_forward(x, w1, b1, w2, b2, w3, b3)
    assert out.shape == (batch, num_classes)
    assert jnp.allclose(out, ref, atol=1e-3, rtol=1e-3), "mismatch vs JAX reference"

    print("KERNEL_OK")
</pallas_src>

<mosaic_0001>
module attributes {stable_mosaic.version = 11 : i64} {
  func.func @mlp_kernel(%arg0: i32, %arg1: memref<8x128xf32, #tpu.memory_space<vmem>>, %arg2: memref<3x128x128xbf16, #tpu.memory_space<vmem>>, %arg3: memref<3x1x128xf32, #tpu.memory_space<vmem>>, %arg4: memref<8x128xf32, #tpu.memory_space<vmem>>) attributes {dimension_semantics = [#tpu.dimension_semantics<parallel>], iteration_bounds = array<i64: 1>, scalar_prefetch = 0 : i64, scratch_operands = 0 : i64, tpu.core_type = #tpu.core_type<tc>, window_params = [{transform_indices = @transform_0, window_bounds = array<i64: 8, 128>}, {pipeline_mode = #tpu.pipeline_mode<synchronous>, transform_indices = @transform_1, window_bounds = array<i64: 3, 128, 128>}, {pipeline_mode = #tpu.pipeline_mode<synchronous>, transform_indices = @transform_2, window_bounds = array<i64: 3, 1, 128>}, {transform_indices = @transform_3, window_bounds = array<i64: 8, 128>}]} {
    %c0 = arith.constant 0 : index
    %c0_0 = arith.constant 0 : index
    %0 = vector.load %arg1[%c0, %c0_0] : memref<8x128xf32, #tpu.memory_space<vmem>>, vector<8x128xf32>
    %1 = arith.truncf %0 : vector<8x128xf32> to vector<8x128xbf16>
    %c0_1 = arith.constant 0 : index
    %c0_2 = arith.constant 0 : index
    %c0_3 = arith.constant 0 : index
    %2 = vector.load %arg2[%c0_1, %c0_2, %c0_3] : memref<3x128x128xbf16, #tpu.memory_space<vmem>>, vector<1x128x128xbf16>
    %3 = vector.shape_cast %2 : vector<1x128x128xbf16> to vector<128x128xbf16>
    %cst = arith.constant dense<0.000000e+00> : vector<8x128xf32>
    %4 = tpu.matmul %1, %3, %cst {dimension_numbers = #tpu.dot_dimension_numbers<[1], [0], [0], [1], [0, 0, 1, 1], [], []>} : vector<8x128xbf16>, vector<128x128xbf16>, vector<8x128xf32> -> vector<8x128xf32>
    %c0_4 = arith.constant 0 : index
    %c0_5 = arith.constant 0 : index
    %c0_6 = arith.constant 0 : index
    %5 = vector.load %arg3[%c0_4, %c0_5, %c0_6] : memref<3x1x128xf32, #tpu.memory_space<vmem>>, vector<1x1x128xf32>
    %6 = vector.shape_cast %5 : vector<1x1x128xf32> to vector<1x128xf32>
    %7 = vector.broadcast %6 : vector<1x128xf32> to vector<8x128xf32>
    %8 = arith.addf %4, %7 : vector<8x128xf32>
    %cst_7 = arith.constant 0.000000e+00 : f32
    %9 = vector.broadcast %cst_7 : f32 to vector<8x128xf32>
    %10 = arith.maximumf %8, %9 : vector<8x128xf32>
    %11 = arith.truncf %10 : vector<8x128xf32> to vector<8x128xbf16>
    %c1 = arith.constant 1 : index
    %c0_8 = arith.constant 0 : index
    %c0_9 = arith.constant 0 : index
    %12 = vector.load %arg2[%c1, %c0_8, %c0_9] : memref<3x128x128xbf16, #tpu.memory_space<vmem>>, vector<1x128x128xbf16>
    %13 = vector.shape_cast %12 : vector<1x128x128xbf16> to vector<128x128xbf16>
    %cst_10 = arith.constant dense<0.000000e+00> : vector<8x128xf32>
    %14 = tpu.matmul %11, %13, %cst_10 {dimension_numbers = #tpu.dot_dimension_numbers<[1], [0], [0], [1], [0, 0, 1, 1], [], []>} : vector<8x128xbf16>, vector<128x128xbf16>, vector<8x128xf32> -> vector<8x128xf32>
    %c1_11 = arith.constant 1 : index
    %c0_12 = arith.constant 0 : index
    %c0_13 = arith.constant 0 : index
    %15 = vector.load %arg3[%c1_11, %c0_12, %c0_13] : memref<3x1x128xf32, #tpu.memory_space<vmem>>, vector<1x1x128xf32>
    %16 = vector.shape_cast %15 : vector<1x1x128xf32> to vector<1x128xf32>
    %17 = vector.broadcast %16 : vector<1x128xf32> to vector<8x128xf32>
    %18 = arith.addf %14, %17 : vector<8x128xf32>
    %cst_14 = arith.constant 0.000000e+00 : f32
    %19 = vector.broadcast %cst_14 : f32 to vector<8x128xf32>
    %20 = arith.maximumf %18, %19 : vector<8x128xf32>
    %21 = arith.truncf %20 : vector<8x128xf32> to vector<8x128xbf16>
    %c2 = arith.constant 2 : index
    %c0_15 = arith.constant 0 : index
    %c0_16 = arith.constant 0 : index
    %22 = vector.load %arg2[%c2, %c0_15, %c0_16] : memref<3x128x128xbf16, #tpu.memory_space<vmem>>, vector<1x128x128xbf16>
    %23 = vector.shape_cast %22 : vector<1x128x128xbf16> to vector<128x128xbf16>
    %cst_17 = arith.constant dense<0.000000e+00> : vector<8x128xf32>
    %24 = tpu.matmul %21, %23, %cst_17 {dimension_numbers = #tpu.dot_dimension_numbers<[1], [0], [0], [1], [0, 0, 1, 1], [], []>} : vector<8x128xbf16>, vector<128x128xbf16>, vector<8x128xf32> -> vector<8x128xf32>
    %c2_18 = arith.constant 2 : index
    %c0_19 = arith.constant 0 : index
    %c0_20 = arith.constant 0 : index
    %25 = vector.load %arg3[%c2_18, %c0_19, %c0_20] : memref<3x1x128xf32, #tpu.memory_space<vmem>>, vector<1x1x128xf32>
    %26 = vector.shape_cast %25 : vector<1x1x128xf32> to vector<1x128xf32>
    %27 = vector.broadcast %26 : vector<1x128xf32> to vector<8x128xf32>
    %28 = arith.addf %24, %27 : vector<8x128xf32>
    %c0_21 = arith.constant 0 : index
    %c0_22 = arith.constant 0 : index
    %29 = vector.load %arg4[%c0_21, %c0_22] : memref<8x128xf32, #tpu.memory_space<vmem>>, vector<8x128xf32>
    tpu.vector_store %arg4[%c0_21, %c0_22], %28 {strides = array<i32>} : memref<8x128xf32, #tpu.memory_space<vmem>>, vector<8x128xf32>,
    return
  }
  func.func @transform_0(%arg0: i32) -> (i32, i32) {
    %c0_i32 = arith.constant 0 : i32
    %c0_i32_0 = arith.constant 0 : i32
    return %arg0, %c0_i32 : i32, i32
  }
  func.func @transform_1(%arg0: i32) -> (i32, i32, i32) {
    %c0_i32 = arith.constant 0 : i32
    %c0_i32_0 = arith.constant 0 : i32
    %c0_i32_1 = arith.constant 0 : i32
    %c0_i32_2 = arith.constant 0 : i32
    return %c0_i32, %c0_i32_0, %c0_i32_1 : i32, i32, i32
  }
  func.func @transform_2(%arg0: i32) -> (i32, i32, i32) {
    %c0_i32 = arith.constant 0 : i32
    %c0_i32_0 = arith.constant 0 : i32
    %c0_i32_1 = arith.constant 0 : i32
    %c0_i32_2 = arith.constant 0 : i32
    return %c0_i32, %c0_i32_0, %c0_i32_1 : i32, i32, i32
  }
  func.func @transform_3(%arg0: i32) -> (i32, i32) {
    %c0_i32 = arith.constant 0 : i32
    %c0_i32_0 = arith.constant 0 : i32
    return %arg0, %c0_i32 : i32, i32
  }
}

</mosaic_0001>

<bundles_post_ra>
// kernel: tpu_custom_call.1
= control target key start
LH: loop header
LB: loop body
LE: loop exit
PB: predicated region body
PF: predicated region fallthrough
CT: control target
= control target key end

     0   :  { %8 = vsyncpa [#allocation3], 0  ;;  %s730_s0 = inlined_call_operand.hbm [shape: f32[8,128], index: 0, kind: input, shape index: {}]   ;;  %s731_s1 = inlined_call_operand.hbm [shape: bf16[3,128,128], index: 1, kind: input, shape index: {}]   ;;  %s732_s2 = inlined_call_operand.vmem [shape: f32[3,1,128], index: 2, kind: input, shape index: {}]   ;;  %s733_s3 = inlined_call_operand.hbm [shape: f32[8,128], index: 3, kind: output, shape index: {}]  }
   0x1   :  { %9 = vsyncpa [#allocation6], 0 }
   0x2   :  { %10 = vsyncpa [#allocation4], 0  ;;  %s621_s12 = smov [#allocation2]   ;;  %s622_s14 = smov [#allocation5]  }
   0x3   :  { %s17_s13 = sshll.u32 %s621_s12, 4  ;;  %s26_s15 = sshll.u32 %s622_s14, 4  ;;  %s18_s13 = int_to_ptr.vmem [resolvable:$true] %s17_s13  ;;  %s648_s15 = int_to_ptr.vmem [resolvable:$true] %s26_s15 }
   0x4   :  { %s549_s18 = scalar_lea.hbm %s730_s0, 128 }
   0x5   :  { %p550_p0 = scmp.ne.s32.totalorder %s730_s0, %s549_s18  ;;  %p553_p1 = scmp.lt.u32.totalorder %s549_s18, %s730_s0 }
   0x7   :  { %p555_p2 = pnand %p553_p1, %p550_p0 }
   0x9   :  { %558 = shalt.err (!%p555_p2)
}
   0xa   :  { %s559_s23 = scalar_lea.vmem %s18_s13, 128  ;;  %p564_p4 = scmp.lt.s32.totalorder %s18_s13, %s18_s13 }
   0xb   :  { %p560_p3 = scmp.ne.s32.totalorder %s18_s13, %s559_s23  ;;  %p565_p5 = scmp.lt.s32.totalorder %s559_s23, %s559_s23 }
   0xd   :  { %p566_p6 = por %p565_p5, %p564_p4 }
   0xf   :  { %p567_p7 = pnand %p566_p6, %p560_p3 }
  0x11   :  { %570 = shalt.err (!%p567_p7)
}
  0x12   :  { %20 = dma.hbm_to_vmem [thread:$0]  %s730_s0, 128, %s18_s13, [#allocation3]  }
  0x13   :  { %s571_s28 = scalar_lea.hbm %s731_s1, 3072 }
  0x14   :  { %p572_p8 = scmp.ne.s32.totalorder %s731_s1, %s571_s28  ;;  %p575_p9 = scmp.lt.u32.totalorder %s571_s28, %s731_s1 }
  0x16   :  { %p577_p10 = pnand %p575_p9, %p572_p8 }
  0x18   :  { %580 = shalt.err (!%p577_p10)
}
  0x19   :  { %s581_s6 = scalar_lea.vmem %s648_s15, 3072  ;;  %p586_p12 = scmp.lt.s32.totalorder %s648_s15, %s648_s15 }
  0x1a   :  { %p582_p11 = scmp.ne.s32.totalorder %s648_s15, %s581_s6  ;;  %p587_p13 = scmp.lt.s32.totalorder %s581_s6, %s581_s6 }
  0x1c   :  { %p588_p0 = por %p587_p13, %p586_p12 }
  0x1e   :  { %p589_p1 = pnand %p588_p0, %p582_p11 }
  0x20   :  { %592 = shalt.err (!%p589_p1)
}
  0x21   :  { %s623_s0 = smov 64   ;;  %s624_s7 = smov 4  }
  0x22   :  { %32 = dma.hbm_to_vmem [thread:$0]  %s731_s1, 3072, %s648_s15, [#allocation6], %s623_s0, %s623_s0, %s624_s7  }
  0x23   :  { %615 = dma.done.wait [#allocation3], 128  }
  0x24   :  { %616 = vsyncadd [#allocation3], 4294967168 }
  0x25   :  { %617 = dma.done.wait [#allocation6], 3072  }
  0x26   :  { %618 = vsyncadd [#allocation6], 4294964224  ;;  %v625_v0 = vmov 0.0   ;;  %vm626_vm0 = vmmov 0   ;;  %v525_v1 = vld [vmem:[#allocation5] sm:$0xff]   ;;  %v526_v2 = vld [vmem:[#allocation5 + $0x8] sm:$0xff]  }
  0x27   :  { %458 = vmatprep.subr.bf16.mxu0 %v625_v0  ;;  %474 = vmatprep.mubr.msk.bf16.mxu0 %vm626_vm0, %v625_v0  ;;  %v527_v3 = vld [vmem:[#allocation5 + $0x10] sm:$0xff]   ;;  %v533_v4 = vld [vmem:[#allocation5 + $0x40] sm:$0xff]   ;;  %v528_v5 = vld [vmem:[#allocation5 + $0x18] sm:$0xff]   ;;  %s627_s15 = smov [#allocation7]  }
  0x28   :  { %478 = vmatprep.subr.bf16.mxu1 %v625_v0  ;;  %494 = vmatprep.mubr.msk.bf16.mxu1 %vm626_vm0, %v625_v0  ;;  %v534_v6 = vld [vmem:[#allocation5 + $0x48] sm:$0xff]   ;;  %v529_v7 = vld [vmem:[#allocation5 + $0x20] sm:$0xff]   ;;  %v535_v8 = vld [vmem:[#allocation5 + $0x50] sm:$0xff]   ;;  %s392_s16 = sshll.u32 %s627_s15, 4  ;;  %s393_s16 = int_to_ptr.vmem [resolvable:$true] %s392_s16 }
  0x29   :  { %459 = vmatpush3.bf16.msra.mxu0 %v525_v1  ;;  %479 = vmatpush3.bf16.msra.mxu1 %v533_v4  ;;  %v530_v9 = vld [vmem:[#allocation5 + $0x28] sm:$0xff]   ;;  %v536_v10 = vld [vmem:[#allocation5 + $0x58] sm:$0xff]   ;;  %v531_v11 = vld [vmem:[#allocation5 + $0x30] sm:$0xff]   ;;  %s593_s17 = scalar_lea.vmem %s393_s16, 128  ;;  %p598_p3 = scmp.lt.s32.totalorder %s393_s16, %s393_s16 }
  0x2a   :  { %460 = vmatprep.subr.bf16.mxu0 %v625_v0  ;;  %480 = vmatprep.subr.bf16.mxu1 %v625_v0  ;;  %v537_v12 = vld [vmem:[#allocation5 + $0x60] sm:$0xff]   ;;  %v532_v13 = vld [vmem:[#allocation5 + $0x38] sm:$0xff]   ;;  %v538_v15 = vld [vmem:[#allocation5 + $0x68] sm:$0xff]   ;;  %p594_p2 = scmp.ne.s32.totalorder %s393_s16, %s593_s17  ;;  %p599_p4 = scmp.lt.s32.totalorder %s593_s17, %s593_s17 }
  0x2b   :  { %v42_v14 = vld [vmem:[#allocation2] sm:$0xff]  ;;  %v539_v17 = vld [vmem:[#allocation5 + $0x70] sm:$0xff]   ;;  %v541_v19 = vld [vmem:[#allocation5 + $0x80] sm:$0xff]  }
  0x2c   :  { %v43_v16 = vpack.c.bf16 %v42_v14, %v42_v14  ;;  %v540_v18 = vld [vmem:[#allocation5 + $0x78] sm:$0xff]   ;;  %v542_v20 = vld [vmem:[#allocation5 + $0x88] sm:$0xff]   ;;  %v543_v21 = vld [vmem:[#allocation5 + $0x90] sm:$0xff]   ;;  %p600_p5 = por %p599_p4, %p598_p3 }
  0x2d   :  { %461 = vmatpush3.bf16.msra.mxu0 %v526_v2  ;;  %481 = vmatpush3.bf16.msra.mxu1 %v534_v6  ;;  %v544_v22 = vld [vmem:[#allocation5 + $0x98] sm:$0xff]   ;;  %v545_v23 = vld [vmem:[#allocation5 + $0xa0] sm:$0xff]   ;;  %v546_v24 = vld [vmem:[#allocation5 + $0xa8] sm:$0xff]  }
  0x2e   :  { %462 = vmatprep.subr.bf16.mxu0 %v625_v0  ;;  %482 = vmatprep.subr.bf16.mxu1 %v625_v0  ;;  %v402_v25 = vld [vmem:[%s732_s2] ss:$0 sm:$0xff]  ;;  %v547_v33 = vld [vmem:[#allocation5 + $0xb0] sm:$0xff]   ;;  %v412_v35 = vld [vmem:[%s732_s2 + $0x1] ss:$0 sm:$0xff]  ;;  %p601_p6 = pnand %p600_p5, %p594_p2 }
  0x2f   :  { %v548_v34 = vld [vmem:[#allocation5 + $0xb8] sm:$0xff]  }
  0x30   :  { %v422_v43 = vld [vmem:[%s732_s2 + $0x2] ss:$0 sm:$0xff] }
  0x31   :  { %463 = vmatpush3.bf16.msra.mxu0 %v527_v3  ;;  %483 = vmatpush3.bf16.msra.mxu1 %v535_v8 }
  0x32   :  { %464 = vmatprep.subr.bf16.mxu0 %v625_v0  ;;  %484 = vmatprep.subr.bf16.mxu1 %v625_v0 }
  0x35   :  { %465 = vmatpush3.bf16.msra.mxu0 %v528_v5  ;;  %485 = vmatpush3.bf16.msra.mxu1 %v536_v10 }
  0x36   :  { %466 = vmatprep.subr.bf16.mxu0 %v625_v0  ;;  %486 = vmatprep.subr.bf16.mxu1 %v625_v0 }
  0x39   :  { %467 = vmatpush3.bf16.msra.mxu0 %v529_v7  ;;  %487 = vmatpush3.bf16.msra.mxu1 %v537_v12 }
  0x3a   :  { %468 = vmatprep.subr.bf16.mxu0 %v625_v0  ;;  %488 = vmatprep.subr.bf16.mxu1 %v625_v0 }
  0x3d   :  { %469 = vmatpush3.bf16.msra.mxu0 %v530_v9  ;;  %489 = vmatpush3.bf16.msra.mxu1 %v538_v15 }
  0x3e   :  { %470 = vmatprep.subr.bf16.mxu0 %v625_v0  ;;  %490 = vmatprep.subr.bf16.mxu1 %v625_v0 }
  0x41   :  { %471 = vmatpush3.bf16.msra.mxu0 %v531_v11  ;;  %491 = vmatpush3.bf16.msra.mxu1 %v539_v17 }
  0x42   :  { %472 = vmatprep.subr.bf16.mxu0 %v625_v0  ;;  %492 = vmatprep.subr.bf16.mxu1 %v625_v0 }
  0x45   :  { %473 = vmatpush3.bf16.msra.mxu0 %v532_v13  ;;  %493 = vmatpush3.bf16.msra.mxu1 %v540_v18 }
  0x46   :  { %498 = vmatprep.subr.bf16.mxu0 %v625_v0 }
  0x48   :  { %475 = vmatmul.mubr.bf16.vlgmr.msra.gmra.mrb[0].mxu0 %v43_v16 }
  0x49   :  { %514 = vmatprep.mubr.msk.bf16.mxu0 %vm626_vm0, %v625_v0  ;;  %499 = vmatpush3.bf16.msra.mxu0 %v541_v19 }
  0x4a   :  { %500 = vmatprep.subr.bf16.mxu0 %v625_v0 }
  0x4d   :  { %501 = vmatpush3.bf16.msra.mxu0 %v542_v20 }
  0x4e   :  { %502 = vmatprep.subr.bf16.mxu0 %v625_v0 }
  0x51   :  { %503 = vmatpush3.bf16.msra.mxu0 %v543_v21 }
  0x52   :  { %504 = vmatprep.subr.bf16.mxu0 %v625_v0 }
  0x55   :  { %505 = vmatpush3.bf16.msra.mxu0 %v544_v22 }
  0x56   :  { %506 = vmatprep.subr.bf16.mxu0 %v625_v0 }
  0x59   :  { %507 = vmatpush3.bf16.msra.mxu0 %v545_v23 }
  0x5a   :  { %508 = vmatprep.subr.bf16.mxu0 %v625_v0 }
  0x5d   :  { %509 = vmatpush3.bf16.msra.mxu0 %v546_v24 }
  0x5e   :  { %510 = vmatprep.subr.bf16.mxu0 %v625_v0 }
  0x61   :  { %511 = vmatpush3.bf16.msra.mxu0 %v547_v33 }
  0x62   :  { %512 = vmatprep.subr.bf16.mxu0 %v625_v0 }
  0x65   :  { %513 = vmatpush3.bf16.msra.mxu0 %v548_v34 }
 0x11b   :  { %v149_v26 = vpop.f32.mrb[0].mxu0 }
 0x11c   :  { %v150_v27 = vadd.f32 %v402_v25, %v149_v26  ;;  %v476_v28 = vpop.f32.mrb[1].mxu0 }
 0x11d   :  { %v152_v29 = vpop.f32.mrb[2].mxu0 }
 0x11e   :  { %v155_v30 = vmax.f32 %v150_v27, 0.0  ;;  %v477_v31 = vpop.f32.mrb[3].mxu0 }
 0x120   :  { %v156_v32 = vpack.c.bf16 %v155_v30, %v155_v30 }
 0x122   :  { %495 = vmatmul.mubr.bf16.vlgmr.msra.gmra.mrb[0].mxu1 %v156_v32 }
 0x1f5   :  { %v264_v36 = vpop.f32.mrb[0].mxu1 }
 0x1f6   :  { %v265_v37 = vadd.f32 %v412_v35, %v264_v36  ;;  %v496_v38 = vpop.f32.mrb[1].mxu1 }
 0x1f7   :  { %v267_v39 = vpop.f32.mrb[2].mxu1 }
 0x1f8   :  { %v270_v40 = vmax.f32 %v265_v37, 0.0  ;;  %v497_v41 = vpop.f32.mrb[3].mxu1 }
 0x1fa   :  { %v271_v42 = vpack.c.bf16 %v270_v40, %v270_v40 }
 0x1fc   :  { %515 = vmatmul.mubr.bf16.vlgmr.msra.gmra.mrb[4].mxu0 %v271_v42 }
 0x2cf   :  { %v379_v44 = vpop.f32.mrb[4].mxu0 }
 0x2d0   :  { %v380_v45 = vadd.f32 %v422_v43, %v379_v44  ;;  %v516_v46 = vpop.f32.mrb[5].mxu0 }
 0x2d1   :  { %v382_v47 = vpop.f32.mrb[6].mxu0 }
 0x2d2   :  { %385 = vst [vmem:[#allocation7] sm:$0xff] %v380_v45  ;;  %v517_v48 = vpop.f32.mrb[7].mxu0 }
 0x2d3   :  { %604 = shalt.err (!%p601_p6)
}
 0x2d4   :  { %s605_s2 = scalar_lea.hbm %s733_s3, 128 }
 0x2d5   :  { %p606_p7 = scmp.ne.s32.totalorder %s733_s3, %s605_s2  ;;  %p609_p8 = scmp.lt.u32.totalorder %s605_s2, %s733_s3 }
 0x2d7   :  { %p611_p9 = pnand %p609_p8, %p606_p7 }
 0x2d9   :  { %614 = shalt.err (!%p611_p9)
}
 0x2da   :  { %395 = dma.vmem_to_hbm [thread:$0]  %s393_s16, 128, %s733_s3, [#allocation4]  }
 0x2db   :  { %619 = dma.done.wait [#allocation4], 128  }
 0x2dc   :  { %620 = vsyncadd [#allocation4], 4294967168 }
 0x2dd   :  { %399 = vsyncpa [#allocation3], 1 }
 0x2de   :  { %400 = vsyncpa [#allocation6], 1 }
 0x2df   :  { %401 = vsyncpa [#allocation4], 1 }

</bundles_post_ra>
